<compile_context>
chip_gen: v5e
topology: v5e:2x2
jax: 0.10.0
libtpu: 0.0.40
codegen_flags: <defaults>
</compile_context>

<pallas_src>
import functools

import jax
import jax.numpy as jnp
from jax import lax
from jax.experimental import pallas as pl
from jax.experimental.pallas import tpu as pltpu

LANE = 128             # vreg lane width
MAX_BLOCK_ROWS = 2048  # (2048,128) f32 = 1 MiB per input per pipeline buffer
NCORES = 2             # leading "parallel" axis: 2 TCs on v7x, harmless elsewhere


def _make_kernel(apply_non_lin, total, block_rows, blocks_per_core, needs_mask):
    """Builds the streaming-reduction kernel (all closure args are static)."""

    def kernel(x_ref, y_ref, out_ref):
        c = pl.program_id(0)   # "parallel" (core) axis
        j = pl.program_id(1)   # "arbitrary" reduction axis

        # Output block (1, 3, LANE) is resident across the whole inner axis:
        # zero it on the first step of each core's sweep.
        @pl.when(j == 0)
        def _():
            out_ref[...] = jnp.zeros_like(out_ref)

        # Cast in VMEM (free filler); inputs stream in their native dtype.
        x = x_ref[...].astype(jnp.float32)
        y = y_ref[...].astype(jnp.float32)
        if apply_non_lin:
            x = jax.nn.sigmoid(x)

        if needs_mask:
            # Mask every element whose flat index >= total. This covers the
            # ragged last block, any lane padding, and fully out-of-range
            # (clamped, duplicate-read) blocks of the last core.
            # NOTE: assumes total < 2**31 (int32 flat element indices).
            blk = c * blocks_per_core + j            # logical (unclamped) block
            row0 = blk * block_rows
            rows = row0 + lax.broadcasted_iota(jnp.int32, (block_rows, LANE), 0)
            lanes = lax.broadcasted_iota(jnp.int32, (block_rows, LANE), 1)
            valid = rows * LANE + lanes < total
            x = jnp.where(valid, x, 0.0)
            y = jnp.where(valid, y, 0.0)

        # Per-lane partial sums; only one tiny intra-vreg sublane reduce per
        # quantity per step, everything else is plain VPU adds under the DMA.
        s_xy = jnp.sum(x * y, axis=0, keepdims=True)[None]   # (1, 1, LANE)
        s_x = jnp.sum(x, axis=0, keepdims=True)[None]
        s_y = jnp.sum(y, axis=0, keepdims=True)[None]

        out_ref[:, 0:1, :] += s_xy
        out_ref[:, 1:2, :] += s_x
        out_ref[:, 2:3, :] += s_y

    return kernel


@functools.partial(jax.jit, static_argnames=("apply_non_lin",))
def generalized_loss(x, y, alpha_p=1.0, alpha_r=1.0, beta=1.0,
                     apply_non_lin=True):
    epsilon = 1e-07

    total = x.size
    xf = x.reshape(-1)   # native dtype; no wrapper upcast
    yf = y.reshape(-1)

    # 2D lane-major view. Reshape is free when total % 128 == 0 (common case);
    # otherwise pad only up to the next lane multiple (rare path).
    n_rows = -(-total // LANE)
    lane_pad = n_rows * LANE - total
    if lane_pad:
        # TODO(synk): this still materializes a copy on the uncommon
        # non-multiple-of-128 path; the padded values are masked in-kernel.
        xf = jnp.pad(xf, (0, lane_pad))
        yf = jnp.pad(yf, (0, lane_pad))
    x2 = xf.reshape(n_rows, LANE)
    y2 = yf.reshape(n_rows, LANE)

    # Tiling: large streaming blocks, split contiguously across NCORES.
    block_rows = min(MAX_BLOCK_ROWS, n_rows)      # full-dim block if array small
    n_blocks = -(-n_rows // block_rows)
    bpc = -(-n_blocks // NCORES)                  # row-blocks per core

    covered = NCORES * bpc * block_rows * LANE    # elements the grid touches
    needs_mask = covered != total                 # static python bool

    def in_map(c, j):
        # Clamp so a fully out-of-range logical block (last core, odd block
        # count) re-reads a valid block; the in-kernel mask zeroes it out.
        return (jnp.minimum(c * bpc + j, n_blocks - 1), 0)

    partials = pl.pallas_call(
        _make_kernel(apply_non_lin, total, block_rows, bpc, needs_mask),
        out_shape=jax.ShapeDtypeStruct((NCORES, 3, LANE), jnp.float32),
        grid_spec=pltpu.PrefetchScalarGridSpec(
            num_scalar_prefetch=0,
            grid=(NCORES, bpc),
            in_specs=[
                pl.BlockSpec((block_rows, LANE), in_map),
                pl.BlockSpec((block_rows, LANE), in_map),
            ],
            out_specs=pl.BlockSpec((1, 3, LANE), lambda c, j: (c, 0, 0)),
        ),
        compiler_params=pltpu.CompilerParams(
            dimension_semantics=("parallel", "arbitrary"),
        ),
    )(x2, y2)

    # Tiny final reduce + scalar glue (matches the PyTorch formula).
    sums = jnp.sum(partials, axis=(0, 2))          # (3,) = [s_xy, s_x, s_y]
    s_xy, s_x, s_y = sums[0], sums[1], sums[2]
    tp = s_xy + epsilon
    fp = (s_x - s_xy) + epsilon                    # sum(x * (1 - y)) + eps
    fn = (s_y - s_xy) + epsilon                    # sum((1 - x) * y) + eps

    prec = tp / (tp + alpha_p * fp)
    rec = tp / (tp + alpha_r * fn)
    beta2 = beta ** 2
    # TODO(synk): the optional `dict` argument of forward() (runtime rescaling
    # of alpha_p / alpha_r / beta) is host-side scalar glue; pass pre-scaled
    # scalars into this wrapper instead.
    return 1.0 - (1.0 + beta2) / (1.0 / prec + beta2 / rec)


def _reference_loss(x, y, alpha_p=1.0, alpha_r=1.0, beta=1.0,
                    apply_non_lin=True):
    eps = 1e-07
    xs = jax.nn.sigmoid(x) if apply_non_lin else x
    tp = jnp.sum(xs * y) + eps
    fp = jnp.sum(xs * (1.0 - y)) + eps
    fn = jnp.sum((1.0 - xs) * y) + eps
    prec = tp / (tp + alpha_p * fp)
    rec = tp / (tp + alpha_r * fn)
    b2 = beta ** 2
    return 1.0 - (1.0 + b2) / (1.0 / prec + b2 / rec)


if __name__ == "__main__":
    key = jax.random.PRNGKey(0)
    kx, ky, kx2, ky2 = jax.random.split(key, 4)

    # NCHW: batch=2, channels=4, spatial=16x16 (total divisible by 128 -> no pad).
    x = jax.random.normal(kx, (2, 4, 16, 16), dtype=jnp.float32)   # logits
    y = (jax.random.uniform(ky, (2, 4, 16, 16)) > 0.5).astype(jnp.float32)

    loss = generalized_loss(x, y, alpha_p=1.0, alpha_r=1.0, beta=1.0,
                            apply_non_lin=True)
    loss = jax.block_until_ready(loss)
    ref = _reference_loss(x, y, 1.0, 1.0, 1.0, apply_non_lin=True)
    assert jnp.allclose(loss, ref, atol=1e-5, rtol=1e-4), (loss, ref)

    # Ragged shape (total % 128 != 0), no sigmoid, non-default alphas/beta.
    x2 = jax.random.uniform(kx2, (2, 3, 7, 5), dtype=jnp.float32)  # probs
    y2 = (jax.random.uniform(ky2, (2, 3, 7, 5)) > 0.5).astype(jnp.float32)
    loss2 = generalized_loss(x2, y2, alpha_p=0.5, alpha_r=2.0, beta=2.0,
                             apply_non_lin=False)
    loss2 = jax.block_until_ready(loss2)
    ref2 = _reference_loss(x2, y2, 0.5, 2.0, 2.0, apply_non_lin=False)
    assert jnp.allclose(loss2, ref2, atol=1e-5, rtol=1e-4), (loss2, ref2)

    print("KERNEL_OK")
</pallas_src>

<mosaic_0001>
module attributes {stable_mosaic.version = 11 : i64} {
  func.func @kernel(%arg0: i32, %arg1: i32, %arg2: memref<16x128xf32, #tpu.memory_space<vmem>>, %arg3: memref<16x128xf32, #tpu.memory_space<vmem>>, %arg4: memref<1x3x128xf32, #tpu.memory_space<vmem>>) attributes {dimension_semantics = [#tpu.dimension_semantics<parallel>, #tpu.dimension_semantics<arbitrary>], iteration_bounds = array<i64: 2, 1>, scalar_prefetch = 0 : i64, scratch_operands = 0 : i64, tpu.core_type = #tpu.core_type<tc>, window_params = [{transform_indices = @transform_0, window_bounds = array<i64: 16, 128>}, {transform_indices = @transform_1, window_bounds = array<i64: 16, 128>}, {transform_indices = @transform_2, window_bounds = array<i64: 1, 3, 128>}]} {
    %c0_i32 = arith.constant 0 : i32
    %0 = arith.cmpi eq, %arg1, %c0_i32 : i32
    %1 = arith.extui %0 : i1 to i32
    %c0_i32_0 = arith.constant 0 : i32
    %2 = arith.cmpi ne, %1, %c0_i32_0 : i32
    scf.if %2 {
      %cst_25 = arith.constant 0.000000e+00 : f32
      %45 = vector.broadcast %cst_25 : f32 to vector<1x3x128xf32>
      %c0_26 = arith.constant 0 : index
      %c0_27 = arith.constant 0 : index
      %c0_28 = arith.constant 0 : index
      %46 = vector.load %arg4[%c0_26, %c0_27, %c0_28] : memref<1x3x128xf32, #tpu.memory_space<vmem>>, vector<1x3x128xf32>
      tpu.vector_store %arg4[%c0_26, %c0_27, %c0_28], %45 {strides = array<i32>} : memref<1x3x128xf32, #tpu.memory_space<vmem>>, vector<1x3x128xf32>,
    } else {
    }
    %c0 = arith.constant 0 : index
    %c0_1 = arith.constant 0 : index
    %3 = vector.load %arg2[%c0, %c0_1] : memref<16x128xf32, #tpu.memory_space<vmem>>, vector<16x128xf32>
    %c0_2 = arith.constant 0 : index
    %c0_3 = arith.constant 0 : index
    %4 = vector.load %arg3[%c0_2, %c0_3] : memref<16x128xf32, #tpu.memory_space<vmem>>, vector<16x128xf32>
    %5 = arith.negf %3 : vector<16x128xf32>
    %6 = math.exp %5 : vector<16x128xf32>
    %cst = arith.constant 1.000000e+00 : f32
    %7 = vector.broadcast %cst : f32 to vector<16x128xf32>
    %8 = arith.addf %7, %6 : vector<16x128xf32>
    %9 = arith.divf %7, %8 : vector<16x128xf32>
    %c1_i32 = arith.constant 1 : i32
    %10 = arith.muli %arg0, %c1_i32 : i32
    %11 = arith.addi %10, %arg1 : i32
    %c16_i32 = arith.constant 16 : i32
    %12 = arith.muli %11, %c16_i32 : i32
    %13 = tpu.iota {dimensions = array<i32: 0>} : vector<16x128xi32>
    %14 = vector.broadcast %12 : i32 to vector<16x128xi32>
    %15 = arith.addi %14, %13 : vector<16x128xi32>
    %16 = tpu.iota {dimensions = array<i32: 1>} : vector<16x128xi32>
    %c128_i32 = arith.constant 128 : i32
    %17 = vector.broadcast %c128_i32 : i32 to vector<16x128xi32>
    %18 = arith.muli %15, %17 : vector<16x128xi32>
    %19 = arith.addi %18, %16 : vector<16x128xi32>
    %c2048_i32 = arith.constant 2048 : i32
    %20 = vector.broadcast %c2048_i32 : i32 to vector<16x128xi32>
    %21 = arith.cmpi slt, %19, %20 : vector<16x128xi32>
    %cst_4 = arith.constant 0.000000e+00 : f32
    %22 = vector.broadcast %cst_4 : f32 to vector<16x128xf32>
    %23 = arith.select %21, %9, %22 : vector<16x128xi1>, vector<16x128xf32>
    %cst_5 = arith.constant 0.000000e+00 : f32
    %24 = vector.broadcast %cst_5 : f32 to vector<16x128xf32>
    %25 = arith.select %21, %4, %24 : vector<16x128xi1>, vector<16x128xf32>
    %26 = arith.mulf %23, %25 : vector<16x128xf32>
    %cst_6 = arith.constant dense<0.000000e+00> : vector<128xf32>
    %27 = vector.multi_reduction <add>, %26, %cst_6 [0] : vector<16x128xf32> to vector<128xf32>
    %28 = vector.shape_cast %27 : vector<128xf32> to vector<1x128xf32>
    %29 = vector.shape_cast %28 : vector<1x128xf32> to vector<1x1x128xf32>
    %cst_7 = arith.constant dense<0.000000e+00> : vector<128xf32>
    %30 = vector.multi_reduction <add>, %23, %cst_7 [0] : vector<16x128xf32> to vector<128xf32>
    %31 = vector.shape_cast %30 : vector<128xf32> to vector<1x128xf32>
    %32 = vector.shape_cast %31 : vector<1x128xf32> to vector<1x1x128xf32>
    %cst_8 = arith.constant dense<0.000000e+00> : vector<128xf32>
    %33 = vector.multi_reduction <add>, %25, %cst_8 [0] : vector<16x128xf32> to vector<128xf32>
    %34 = vector.shape_cast %33 : vector<128xf32> to vector<1x128xf32>
    %35 = vector.shape_cast %34 : vector<1x128xf32> to vector<1x1x128xf32>
    %c0_9 = arith.constant 0 : index
    %c0_10 = arith.constant 0 : index
    %c0_11 = arith.constant 0 : index
    %36 = vector.load %arg4[%c0_9, %c0_10, %c0_11] : memref<1x3x128xf32, #tpu.memory_space<vmem>>, vector<1x1x128xf32>
    %37 = arith.addf %36, %29 : vector<1x1x128xf32>
    %c0_12 = arith.constant 0 : index
    %c0_13 = arith.constant 0 : index
    %c0_14 = arith.constant 0 : index
    %38 = vector.load %arg4[%c0_12, %c0_13, %c0_14] : memref<1x3x128xf32, #tpu.memory_space<vmem>>, vector<1x1x128xf32>
    tpu.vector_store %arg4[%c0_12, %c0_13, %c0_14], %37 {strides = array<i32>} : memref<1x3x128xf32, #tpu.memory_space<vmem>>, vector<1x1x128xf32>,
    %c0_15 = arith.constant 0 : index
    %c1 = arith.constant 1 : index
    %c0_16 = arith.constant 0 : index
    %39 = vector.load %arg4[%c0_15, %c1, %c0_16] : memref<1x3x128xf32, #tpu.memory_space<vmem>>, vector<1x1x128xf32>
    %40 = arith.addf %39, %32 : vector<1x1x128xf32>
    %c0_17 = arith.constant 0 : index
    %c1_18 = arith.constant 1 : index
    %c0_19 = arith.constant 0 : index
    %41 = vector.load %arg4[%c0_17, %c1_18, %c0_19] : memref<1x3x128xf32, #tpu.memory_space<vmem>>, vector<1x1x128xf32>
    tpu.vector_store %arg4[%c0_17, %c1_18, %c0_19], %40 {strides = array<i32>} : memref<1x3x128xf32, #tpu.memory_space<vmem>>, vector<1x1x128xf32>,
    %c0_20 = arith.constant 0 : index
    %c2 = arith.constant 2 : index
    %c0_21 = arith.constant 0 : index
    %42 = vector.load %arg4[%c0_20, %c2, %c0_21] : memref<1x3x128xf32, #tpu.memory_space<vmem>>, vector<1x1x128xf32>
    %43 = arith.addf %42, %35 : vector<1x1x128xf32>
    %c0_22 = arith.constant 0 : index
    %c2_23 = arith.constant 2 : index
    %c0_24 = arith.constant 0 : index
    %44 = vector.load %arg4[%c0_22, %c2_23, %c0_24] : memref<1x3x128xf32, #tpu.memory_space<vmem>>, vector<1x1x128xf32>
    tpu.vector_store %arg4[%c0_22, %c2_23, %c0_24], %43 {strides = array<i32>} : memref<1x3x128xf32, #tpu.memory_space<vmem>>, vector<1x1x128xf32>,
    return
  }
  func.func @transform_0(%arg0: i32, %arg1: i32) -> (i32, i32) {
    %c1_i32 = arith.constant 1 : i32
    %0 = arith.muli %arg0, %c1_i32 : i32
    %1 = arith.addi %0, %arg1 : i32
    %c0_i32 = arith.constant 0 : i32
    %2 = arith.minsi %1, %c0_i32 : i32
    %c0_i32_0 = arith.constant 0 : i32
    %c0_i32_1 = arith.constant 0 : i32
    return %2, %c0_i32_0 : i32, i32
  }
  func.func @transform_1(%arg0: i32, %arg1: i32) -> (i32, i32) {
    %c1_i32 = arith.constant 1 : i32
    %0 = arith.muli %arg0, %c1_i32 : i32
    %1 = arith.addi %0, %arg1 : i32
    %c0_i32 = arith.constant 0 : i32
    %2 = arith.minsi %1, %c0_i32 : i32
    %c0_i32_0 = arith.constant 0 : i32
    %c0_i32_1 = arith.constant 0 : i32
    return %2, %c0_i32_0 : i32, i32
  }
  func.func @transform_2(%arg0: i32, %arg1: i32) -> (i32, i32, i32) {
    %c0_i32 = arith.constant 0 : i32
    %c0_i32_0 = arith.constant 0 : i32
    %c0_i32_1 = arith.constant 0 : i32
    return %arg0, %c0_i32, %c0_i32_0 : i32, i32, i32
  }
}

</mosaic_0001>

<bundles_post_ra>
// kernel: generalized_loss.1
= control target key start
LH: loop header
LB: loop body
LE: loop exit
PB: predicated region body
PF: predicated region fallthrough
CT: control target
= control target key end

     0   :  { %s480_s9 = smov 0   ;;  %s482_s10 = smov 0   ;;  %s529_s0 = inlined_call_operand.vmem [shape: f32[16,128], index: 0, kind: input, shape index: {}]   ;;  %s530_s1 = inlined_call_operand.vmem [shape: f32[16,128], index: 1, kind: input, shape index: {}]   ;;  %s531_s2 = inlined_call_operand.vmem [shape: f32[2,3,128], index: 2, kind: output, shape index: {}]  }
   0x1   :  { %s484_s11 = smov 0  }
   0x2 LB: > { %s24_s12 = sadd.s32 1, %s458_s10  ;;  %p396_p0 = scmp.ge.s32.totalorder %s462_s11, 1  ;;  %s462_s11 = sphi %s484_s11, %s12_s11   ;;  %s458_s10 = sphi %s482_s10, %s533_s10   ;;  %s454_s9 = sphi %s480_s9, %s532_s9  }
   0x3   : > { %p26_p1 = scmp.ge.s32.totalorder %s24_s12, 2  ;;  %p160_p2 = scmp.lt.s32.totalorder %s462_s11, 3 }
   0x5   : > { %s535_s12 = smov (%p26_p1, %s24_s12), 0  ;;  %p161_p3 = pnand %p396_p0, %p160_p2 }
   0x6   : > { %p216_p4 = scmp.lt.s32.totalorder (!%p161_p3), %s454_s9, 1  ;;  %p193_p5 = scmp.lt.s32.totalorder (!%p161_p3), %s454_s9, 0 }
   0x7   : > { %164 = sbr.rel (%p161_p3) target bundleno = 70 (0x46), region = 28  ;;  %s404_s13 = sshll.u32 (!%p161_p3), %s454_s9, 4 }
   0xc   : > { %v269_v0 = vlaneseq  ;;  %s217_s14 = scalar_select %p216_p4, %s454_s9, 1  ;;  %v272_v2 = vstv %s404_s13  ;;  %v464_v6 = vmov 0.0  }
   0xd   : > { %s537_s9 = smov (!%p193_p5, %s454_s9), 0 }
   0xe   : > { %v270_v1 = vshrl.u32 %v269_v0, 7  ;;  %s401_s15 = sshll.u32 %s217_s14, 2  ;;  %s397_s19 = sshll.u32 %s537_s9, 1  ;;  %v276_v5 = vand.u32 127, %v269_v0 }
   0xf   : > { %s501_s18 = scalar_lea.vmem %s531_s2, %s401_s15  ;;  %p196_p6 = scmp.lt.s32.totalorder %s397_s19, 1 }
  0x10   : > { %v271_v3 = vadd.s32 8, %v270_v1  ;;  %v273_v4 = vadd.s32 %v272_v2, %v270_v1  ;;  %224 = vst [vmem:[%s501_s18] sm:$0x7] %v464_v6 }
  0x11   : > { %s539_s19 = smov (!%p196_p6, %s397_s19), 1 }
  0x12   : > { %v274_v7 = vadd.s32 %v272_v2, %v271_v3  ;;  %v277_v8 = vmul.u32 128, %v273_v4  ;;  %s398_s20 = sshll.u32 %s539_s19, 3 }
  0x13   : > { %s199_s23 = scalar_lea.vmem %s529_s0, %s398_s20  ;;  %s211_s26 = scalar_lea.vmem %s530_s1, %s398_s20 }
  0x14   : > { %v278_v9 = vmul.u32 128, %v274_v7  ;;  %v279_v10 = vadd.s32 %v277_v8, %v276_v5  ;;  %v225_v12 = vld [vmem:[%s199_s23] sm:$0xff]  ;;  %v226_v13 = vld [vmem:[%s199_s23 + $0x8] sm:$0xff] }
  0x15   : > { %v227_v14 = vld [vmem:[%s211_s26] sm:$0xff]  ;;  %v228_v15 = vld [vmem:[%s211_s26 + $0x8] sm:$0xff]  ;;  %v402_v16 = vmul.f32 -1.442695, %v225_v12  ;;  %v403_v17 = vmul.f32 -1.442695, %v226_v13 }
  0x16   : > { %v280_v11 = vadd.s32 %v278_v9, %v276_v5  ;;  %vm281_vm0 = vcmp.lt.s32.totalorder %v279_v10, 2048 }
  0x17   : > { %v285_v18 = vsel %vm281_vm0, %v227_v14, 0.0  ;;  %432 = vpow2.f32 %v402_v16  ;;  %v316_v30 = vld [vmem:[%s501_s18 + $0x2] sm:$0x1]  ;;  %v313_v4 = vld [vmem:[%s501_s18 + $0x1] sm:$0x1] }
  0x18   : > { %vm282_vm1 = vcmp.lt.s32.totalorder %v280_v11, 2048  ;;  %434 = vpow2.f32 %v403_v17  ;;  %v310_v7 = vld [vmem:[%s501_s18] sm:$0x1] }
  0x19   : > { %v286_v19 = vsel %vm282_vm1, %v228_v15, 0.0 }
  0x1a   : > { %v303_v20 = vadd.f32 %v286_v19, %v285_v18 }
  0x1c   : > { %v304_v21 = vrot.slane %v303_v20, 4 }
  0x1d   : > { %v433_v23 = vpop.eup %432 }
  0x1e   : > { %v305_v22 = vadd.f32 %v304_v21, %v303_v20  ;;  %v435_v25 = vpop.eup %434  ;;  %v235_v26 = vadd.f32 1.0, %v433_v23 }
  0x1f   : > { %v236_v27 = vadd.f32 1.0, %v435_v25 }
  0x20   : > { %v306_v24 = vrot.slane %v305_v22, 2  ;;  %436 = vrcp.f32 %v235_v26  ;;  %vm242_vm2 = vweird.f32 %v235_v26  ;;  %v248_v36 = vand.u32 2147483648, %v235_v26 }
  0x21   : > { %438 = vrcp.f32 %v236_v27  ;;  %v246_v39 = vand.u32 2147483647, %v235_v26  ;;  %v263_v40 = vand.u32 2147483648, %v236_v27  ;;  %vm257_vm4 = vweird.f32 %v236_v27 }
  0x22   : > { %v307_v28 = vadd.f32 %v306_v24, %v305_v22  ;;  %v261_v42 = vand.u32 2147483647, %v236_v27  ;;  %v249_v44 = vor.u32 1.1754944e-38, %v248_v36 }
  0x23   : > { %vm247_vm7 = vcmp.eq.f32.partialorder %v246_v39, 8.507059e+37  ;;  %v264_v47 = vor.u32 1.1754944e-38, %v263_v40 }
  0x24   : > { %v308_v29 = vrot.slane %v307_v28, 1  ;;  %vm262_vm9 = vcmp.eq.f32.partialorder %v261_v42, 8.507059e+37 }
  0x26   : > { %v309_v31 = vadd.f32 %v308_v29, %v307_v28  ;;  %v437_v32 = vpop.eup %436 }
  0x27   : > { %v439_v34 = vpop.eup %438  ;;  %v238_v35 = vmul.f32 %v437_v32, %v235_v26  ;;  %vm243_vm3 = vweird.f32 %v437_v32 }
  0x28   : > { %v317_v33 = vadd.f32 %v316_v30, %v309_v31  ;;  %v253_v37 = vmul.f32 %v439_v34, %v236_v27  ;;  %vm258_vm5 = vweird.f32 %v439_v34  ;;  %vm244_vm6 = vmor %vm242_vm2, %vm243_vm3 }
  0x29   : > { %v239_v38 = vsub.f32 1.0, %v238_v35  ;;  %vm259_vm8 = vmor %vm257_vm4, %vm258_vm5 }
  0x2a   : > { %318 = vst [vmem:[%s501_s18 + $0x2] sm:$0x1] %v317_v33  ;;  %v254_v41 = vsub.f32 1.0, %v253_v37 }
  0x2b   : > { %v240_v43 = vmul.f32 %v437_v32, %v239_v38 }
  0x2c   : > { %v255_v45 = vmul.f32 %v439_v34, %v254_v41 }
  0x2d   : > { %v241_v46 = vadd.f32 %v437_v32, %v240_v43 }
  0x2e   : > { %v256_v48 = vadd.f32 %v439_v34, %v255_v45 }
  0x2f   : > { %v245_v49 = vsel %vm244_vm6, %v437_v32, %v241_v46 }
  0x30   : > { %v250_v50 = vsel %vm247_vm7, %v249_v44, %v245_v49  ;;  %v260_v51 = vsel %vm259_vm8, %v439_v34, %v256_v48 }
  0x31   : > { %v265_v52 = vsel %vm262_vm9, %v264_v47, %v260_v51  ;;  %v283_v53 = vsel %vm281_vm0, %v250_v50, 0.0 }
  0x32   : > { %v284_v54 = vsel %vm282_vm1, %v265_v52, 0.0  ;;  %v287_v55 = vmul.f32 %v285_v18, %v283_v53 }
  0x33   : > { %v288_v56 = vmul.f32 %v286_v19, %v284_v54  ;;  %v296_v57 = vadd.f32 %v284_v54, %v283_v53 }
  0x35   : > { %v289_v58 = vadd.f32 %v288_v56, %v287_v55  ;;  %v297_v59 = vrot.slane %v296_v57, 4 }
  0x37   : > { %v290_v60 = vrot.slane %v289_v58, 4  ;;  %v298_v61 = vadd.f32 %v297_v59, %v296_v57 }
  0x39   : > { %v291_v62 = vadd.f32 %v290_v60, %v289_v58  ;;  %v299_v63 = vrot.slane %v298_v61, 2 }
  0x3b   : > { %v292_v0 = vrot.slane %v291_v62, 2  ;;  %v300_v1 = vadd.f32 %v299_v63, %v298_v61 }
  0x3d   : > { %v293_v2 = vadd.f32 %v292_v0, %v291_v62  ;;  %v301_v3 = vrot.slane %v300_v1, 1 }
  0x3f   : > { %v294_v5 = vrot.slane %v293_v2, 1  ;;  %v302_v6 = vadd.f32 %v301_v3, %v300_v1 }
  0x41   : > { %v295_v8 = vadd.f32 %v294_v5, %v293_v2  ;;  %v314_v9 = vadd.f32 %v313_v4, %v302_v6 }
  0x43   : > { %v311_v10 = vadd.f32 %v310_v7, %v295_v8  ;;  %315 = vst [vmem:[%s501_s18 + $0x1] sm:$0x1] %v314_v9 }
  0x45   : > { %312 = vst [vmem:[%s501_s18] sm:$0x1] %v311_v10 }
  0x46 PF: > { %s12_s11 = sadd.s32 1, %s462_s11   ;;  %s532_s9 = smov %s458_s10 }
  0x47   : > { %p9_p7 = scmp.ge.s32.totalorder %s12_s11, 4   ;;  %s533_s10 = smov %s535_s12 }
  0x49   :  { %11 = sbr.rel (!%p9_p7) target bundleno = 2 (0x2), region = 65 }

</bundles_post_ra>
